<compile_context>
chip_gen: v7x
topology: tpu7x:2x2x1
jax: 0.10.0
libtpu: 0.0.40
codegen_flags: <defaults>
</compile_context>

<pallas_src>
import functools

import jax
import jax.numpy as jnp
from jax.experimental import pallas as pl
from jax.experimental.pallas import tpu as pltpu


def tcn_kernel(x_ref, w_ref, shift_ref, o_ref, xpad_ref, *, kernel_size, pad, t, v):
    """One (batch element, C_out tile) grid step.

    x_ref:     (C_in, T*V)            unpadded input, compute dtype (bf16/f32)
    w_ref:     (K, C_out_tile, C_in)  per-tap conv weights, BN scale pre-folded
    shift_ref: (C_out_tile, 1)        folded conv-bias + BN shift, f32
    o_ref:     (C_out_tile, T*V)      output, f32
    xpad_ref:  VMEM scratch (C_in, (T + 2*pad)*V), temporally padded copy of x
    """
    # Fill the padded scratch once per batch element.  The x block is resident
    # across the C_out-tile axis (inner, "arbitrary" grid axis), so co == 0 is
    # the first grid step for each batch element handled by this core.
    @pl.when(pl.program_id(1) == 0)
    def _fill_padded():
        # Zero only the temporal halo columns, then copy the live centre.
        xpad_ref[:, :pad * v] = jnp.zeros((xpad_ref.shape[0], pad * v), xpad_ref.dtype)
        xpad_ref[:, (pad + t) * v:] = jnp.zeros((xpad_ref.shape[0], pad * v), xpad_ref.dtype)
        xpad_ref[:, pad * v:(pad + t) * v] = x_ref[...]

    co_tile = o_ref.shape[0]
    acc = jnp.zeros((co_tile, t * v), jnp.float32)
    # Unrolled tap loop: each tap is one 2-D matmul with a lane-dense RHS,
    # accumulated on the MXU in f32 (K is small, so vreg accumulation is fine).
    for j in range(kernel_size):
        xs = xpad_ref[:, j * v: j * v + t * v]                     # (C_in, T*V)
        acc = acc + jnp.dot(w_ref[j], xs, preferred_element_type=jnp.float32)

    # f32 epilogue: per-output-channel (per-row) shift, then lane-dense store.
    o_ref[...] = (acc + shift_ref[...]).astype(o_ref.dtype)


def tcn_unit_forward(x, conv_w, conv_b, bn_gamma, bn_beta, bn_mean, bn_var,
                     *, kernel_size=9, stride=1, eps=1e-5,
                     compute_dtype=jnp.bfloat16, co_tile=None):
    """x: (N, C_in, T, V) f32.  conv_w: (C_out, C_in, K, 1).  Returns (N, C_out, T, V) f32."""
    assert stride == 1, "only stride=1 implemented"
    n, c_in, t, v = x.shape
    c_out = conv_w.shape[0]
    pad = (kernel_size - 1) // 2

    if co_tile is None:
        co_tile = c_out if c_out <= 128 else 128
    assert c_out % co_tile == 0
    n_co = c_out // co_tile

    # Fold eval-mode BN into the conv: scale goes into the weights, the shift
    # (conv_b - mean) * scale + beta stays as a single f32 add in the kernel.
    bn_scale = bn_gamma / jnp.sqrt(bn_var + eps)                      # (C_out,)
    w_taps = jnp.transpose(conv_w[:, :, :, 0], (2, 0, 1))             # (K, C_out, C_in)
    w_taps = (w_taps * bn_scale[None, :, None]).astype(compute_dtype)
    shift = ((conv_b - bn_mean) * bn_scale + bn_beta).reshape(c_out, 1).astype(jnp.float32)

    # Lane-dense layout: flatten (T, V) -> T*V in HBM (free contiguous reshape)
    # and cast to the compute dtype (bf16 halves HBM read traffic).
    x_flat = x.reshape(n, c_in, t * v).astype(compute_dtype)

    kernel = functools.partial(tcn_kernel, kernel_size=kernel_size, pad=pad, t=t, v=v)

    out = pl.pallas_call(
        kernel,
        out_shape=jax.ShapeDtypeStruct((n, c_out, t * v), jnp.float32),
        grid_spec=pltpu.PrefetchScalarGridSpec(
            num_scalar_prefetch=0,
            grid=(n, n_co),
            in_specs=[
                # x block is resident across the C_out-tile axis (no re-DMA).
                pl.BlockSpec((None, c_in, t * v), lambda i, co: (i, 0, 0)),
                pl.BlockSpec((kernel_size, co_tile, c_in), lambda i, co: (0, co, 0)),
                pl.BlockSpec((co_tile, 1), lambda i, co: (co, 0)),
            ],
            out_specs=pl.BlockSpec((None, co_tile, t * v), lambda i, co: (i, co, 0)),
            scratch_shapes=[pltpu.VMEM((c_in, (t + 2 * pad) * v), compute_dtype)],
        ),
        compiler_params=pltpu.CompilerParams(
            dimension_semantics=("parallel", "arbitrary")),
    )(x_flat, w_taps, shift)

    return out.reshape(n, c_out, t, v)


def reference_forward(x, conv_w, conv_b, bn_gamma, bn_beta, bn_mean, bn_var,
                      *, kernel_size=9, eps=1e-5):
    """Plain-JAX f32 reference of Conv2d(K,1) + eval BatchNorm2d, NCHW layout."""
    pad = (kernel_size - 1) // 2
    xp = jnp.pad(x, ((0, 0), (0, 0), (pad, pad), (0, 0)))
    t = x.shape[2]
    y = jnp.zeros((x.shape[0], conv_w.shape[0], t, x.shape[3]), jnp.float32)
    for j in range(kernel_size):
        y = y + jnp.einsum("oc,nctv->notv", conv_w[:, :, j, 0], xp[:, :, j:j + t, :])
    y = y + conv_b.reshape(1, -1, 1, 1)
    scale = bn_gamma / jnp.sqrt(bn_var + eps)
    return (y - bn_mean.reshape(1, -1, 1, 1)) * scale.reshape(1, -1, 1, 1) + bn_beta.reshape(1, -1, 1, 1)


if __name__ == "__main__":
    # Small shapes consistent with the module: N=2, C_in=4, C_out=8, T=16, V=25 (num_points).
    N, C_IN, C_OUT, T, V = 2, 4, 8, 16, 25
    K = 9

    key = jax.random.PRNGKey(0)
    kx, kw, kb, kg, kbe, km, kvv = jax.random.split(key, 7)

    x = jax.random.normal(kx, (N, C_IN, T, V), dtype=jnp.float32)

    # conv_init: kaiming_normal_(mode='fan_out') -> std = sqrt(2 / (C_out * K * 1)).
    fan_out = C_OUT * K * 1
    conv_w = jax.random.normal(kw, (C_OUT, C_IN, K, 1), dtype=jnp.float32) * jnp.sqrt(2.0 / fan_out)
    # Non-trivial bias / BN stats so the scale-into-weights + shift fold is exercised.
    conv_b = 0.1 * jax.random.normal(kb, (C_OUT,), dtype=jnp.float32)
    bn_gamma = 0.5 + jax.random.uniform(kg, (C_OUT,), dtype=jnp.float32)
    bn_beta = 0.1 * jax.random.normal(kbe, (C_OUT,), dtype=jnp.float32)
    bn_mean = 0.1 * jax.random.normal(km, (C_OUT,), dtype=jnp.float32)
    bn_var = 0.5 + jax.random.uniform(kvv, (C_OUT,), dtype=jnp.float32)

    ref = reference_forward(x, conv_w, conv_b, bn_gamma, bn_beta, bn_mean, bn_var, kernel_size=K)

    # f32 compute path: tight check against the f32 reference.
    out_f32 = tcn_unit_forward(x, conv_w, conv_b, bn_gamma, bn_beta, bn_mean, bn_var,
                               kernel_size=K, stride=1, compute_dtype=jnp.float32)
    out_f32 = jax.block_until_ready(out_f32)
    assert out_f32.shape == (N, C_OUT, T, V)
    assert jnp.allclose(out_f32, ref, atol=1e-4, rtol=1e-4), "f32 mismatch vs reference"

    # bf16 compute path (default; halves HBM read traffic): looser tolerance.
    out_bf16 = tcn_unit_forward(x, conv_w, conv_b, bn_gamma, bn_beta, bn_mean, bn_var,
                                kernel_size=K, stride=1, compute_dtype=jnp.bfloat16)
    out_bf16 = jax.block_until_ready(out_bf16)
    assert out_bf16.shape == (N, C_OUT, T, V)
    assert jnp.allclose(out_bf16, ref, atol=1e-1, rtol=1e-1), "bf16 mismatch vs reference"

    print("KERNEL_OK")
</pallas_src>

<mosaic_0001>
module attributes {stable_mosaic.version = 11 : i64} {
  func.func @tcn_kernel(%arg0: i32, %arg1: i32, %arg2: memref<1x4x400xf32, #tpu.memory_space<vmem>>, %arg3: memref<9x8x4xf32, #tpu.memory_space<vmem>>, %arg4: memref<8x1xf32, #tpu.memory_space<vmem>>, %arg5: memref<1x8x400xf32, #tpu.memory_space<vmem>>, %arg6: memref<4x600xf32, #tpu.memory_space<vmem>>) attributes {dimension_semantics = [#tpu.dimension_semantics<parallel>, #tpu.dimension_semantics<arbitrary>], iteration_bounds = array<i64: 2, 1>, scalar_prefetch = 0 : i64, scratch_operands = 1 : i64, tpu.core_type = #tpu.core_type<tc>, window_params = [{transform_indices = @transform_0, window_bounds = array<i64: 1, 4, 400>}, {transform_indices = @transform_1, window_bounds = array<i64: 9, 8, 4>}, {transform_indices = @transform_2, window_bounds = array<i64: 8, 1>}, {transform_indices = @transform_3, window_bounds = array<i64: 1, 8, 400>}]} {
    %c0_i32 = arith.constant 0 : i32
    %0 = arith.cmpi eq, %arg1, %c0_i32 : i32
    %1 = arith.extui %0 : i1 to i32
    %c0_i32_0 = arith.constant 0 : i32
    %2 = arith.cmpi ne, %1, %c0_i32_0 : i32
    scf.if %2 {
      %cst_43 = arith.constant 0.000000e+00 : f32
      %55 = vector.broadcast %cst_43 : f32 to vector<4x100xf32>
      %c0_44 = arith.constant 0 : index
      %c0_45 = arith.constant 0 : index
      %56 = vector.load %arg6[%c0_44, %c0_45] : memref<4x600xf32, #tpu.memory_space<vmem>>, vector<4x100xf32>
      tpu.vector_store %arg6[%c0_44, %c0_45], %55 {strides = array<i32>} : memref<4x600xf32, #tpu.memory_space<vmem>>, vector<4x100xf32>,
      %cst_46 = arith.constant 0.000000e+00 : f32
      %57 = vector.broadcast %cst_46 : f32 to vector<4x100xf32>
      %c0_47 = arith.constant 0 : index
      %c500 = arith.constant 500 : index
      %58 = vector.load %arg6[%c0_47, %c500] : memref<4x600xf32, #tpu.memory_space<vmem>>, vector<4x100xf32>
      tpu.vector_store %arg6[%c0_47, %c500], %57 {strides = array<i32>} : memref<4x600xf32, #tpu.memory_space<vmem>>, vector<4x100xf32>,
      %c0_48 = arith.constant 0 : index
      %c0_49 = arith.constant 0 : index
      %c0_50 = arith.constant 0 : index
      %59 = vector.load %arg2[%c0_48, %c0_49, %c0_50] : memref<1x4x400xf32, #tpu.memory_space<vmem>>, vector<1x4x400xf32>
      %60 = vector.shape_cast %59 : vector<1x4x400xf32> to vector<4x400xf32>
      %c0_51 = arith.constant 0 : index
      %c100_52 = arith.constant 100 : index
      %61 = vector.load %arg6[%c0_51, %c100_52] : memref<4x600xf32, #tpu.memory_space<vmem>>, vector<4x400xf32>
      tpu.vector_store %arg6[%c0_51, %c100_52], %60 {strides = array<i32>} : memref<4x600xf32, #tpu.memory_space<vmem>>, vector<4x400xf32>,
    } else {
    }
    %cst = arith.constant 0.000000e+00 : f32
    %3 = vector.broadcast %cst : f32 to vector<8x400xf32>
    %c0 = arith.constant 0 : index
    %c0_1 = arith.constant 0 : index
    %4 = vector.load %arg6[%c0, %c0_1] : memref<4x600xf32, #tpu.memory_space<vmem>>, vector<4x400xf32>
    %c0_2 = arith.constant 0 : index
    %c0_3 = arith.constant 0 : index
    %c0_4 = arith.constant 0 : index
    %5 = vector.load %arg3[%c0_2, %c0_3, %c0_4] : memref<9x8x4xf32, #tpu.memory_space<vmem>>, vector<1x8x4xf32>
    %6 = vector.shape_cast %5 : vector<1x8x4xf32> to vector<8x4xf32>
    %cst_5 = arith.constant dense<0.000000e+00> : vector<8x400xf32>
    %7 = tpu.matmul %6, %4, %cst_5 {dimension_numbers = #tpu.dot_dimension_numbers<[1], [0], [0], [1], [0, 0, 1, 1], [], []>} : vector<8x4xf32>, vector<4x400xf32>, vector<8x400xf32> -> vector<8x400xf32>
    %8 = arith.addf %3, %7 : vector<8x400xf32>
    %c0_6 = arith.constant 0 : index
    %c25 = arith.constant 25 : index
    %9 = vector.load %arg6[%c0_6, %c25] : memref<4x600xf32, #tpu.memory_space<vmem>>, vector<4x400xf32>
    %c1 = arith.constant 1 : index
    %c0_7 = arith.constant 0 : index
    %c0_8 = arith.constant 0 : index
    %10 = vector.load %arg3[%c1, %c0_7, %c0_8] : memref<9x8x4xf32, #tpu.memory_space<vmem>>, vector<1x8x4xf32>
    %11 = vector.shape_cast %10 : vector<1x8x4xf32> to vector<8x4xf32>
    %cst_9 = arith.constant dense<0.000000e+00> : vector<8x400xf32>
    %12 = tpu.matmul %11, %9, %cst_9 {dimension_numbers = #tpu.dot_dimension_numbers<[1], [0], [0], [1], [0, 0, 1, 1], [], []>} : vector<8x4xf32>, vector<4x400xf32>, vector<8x400xf32> -> vector<8x400xf32>
    %13 = arith.addf %8, %12 : vector<8x400xf32>
    %c0_10 = arith.constant 0 : index
    %c50 = arith.constant 50 : index
    %14 = vector.load %arg6[%c0_10, %c50] : memref<4x600xf32, #tpu.memory_space<vmem>>, vector<4x400xf32>
    %c2 = arith.constant 2 : index
    %c0_11 = arith.constant 0 : index
    %c0_12 = arith.constant 0 : index
    %15 = vector.load %arg3[%c2, %c0_11, %c0_12] : memref<9x8x4xf32, #tpu.memory_space<vmem>>, vector<1x8x4xf32>
    %16 = vector.shape_cast %15 : vector<1x8x4xf32> to vector<8x4xf32>
    %cst_13 = arith.constant dense<0.000000e+00> : vector<8x400xf32>
    %17 = tpu.matmul %16, %14, %cst_13 {dimension_numbers = #tpu.dot_dimension_numbers<[1], [0], [0], [1], [0, 0, 1, 1], [], []>} : vector<8x4xf32>, vector<4x400xf32>, vector<8x400xf32> -> vector<8x400xf32>
    %18 = arith.addf %13, %17 : vector<8x400xf32>
    %c0_14 = arith.constant 0 : index
    %c75 = arith.constant 75 : index
    %19 = vector.load %arg6[%c0_14, %c75] : memref<4x600xf32, #tpu.memory_space<vmem>>, vector<4x400xf32>
    %c3 = arith.constant 3 : index
    %c0_15 = arith.constant 0 : index
    %c0_16 = arith.constant 0 : index
    %20 = vector.load %arg3[%c3, %c0_15, %c0_16] : memref<9x8x4xf32, #tpu.memory_space<vmem>>, vector<1x8x4xf32>
    %21 = vector.shape_cast %20 : vector<1x8x4xf32> to vector<8x4xf32>
    %cst_17 = arith.constant dense<0.000000e+00> : vector<8x400xf32>
    %22 = tpu.matmul %21, %19, %cst_17 {dimension_numbers = #tpu.dot_dimension_numbers<[1], [0], [0], [1], [0, 0, 1, 1], [], []>} : vector<8x4xf32>, vector<4x400xf32>, vector<8x400xf32> -> vector<8x400xf32>
    %23 = arith.addf %18, %22 : vector<8x400xf32>
    %c0_18 = arith.constant 0 : index
    %c100 = arith.constant 100 : index
    %24 = vector.load %arg6[%c0_18, %c100] : memref<4x600xf32, #tpu.memory_space<vmem>>, vector<4x400xf32>
    %c4 = arith.constant 4 : index
    %c0_19 = arith.constant 0 : index
    %c0_20 = arith.constant 0 : index
    %25 = vector.load %arg3[%c4, %c0_19, %c0_20] : memref<9x8x4xf32, #tpu.memory_space<vmem>>, vector<1x8x4xf32>
    %26 = vector.shape_cast %25 : vector<1x8x4xf32> to vector<8x4xf32>
    %cst_21 = arith.constant dense<0.000000e+00> : vector<8x400xf32>
    %27 = tpu.matmul %26, %24, %cst_21 {dimension_numbers = #tpu.dot_dimension_numbers<[1], [0], [0], [1], [0, 0, 1, 1], [], []>} : vector<8x4xf32>, vector<4x400xf32>, vector<8x400xf32> -> vector<8x400xf32>
    %28 = arith.addf %23, %27 : vector<8x400xf32>
    %c0_22 = arith.constant 0 : index
    %c125 = arith.constant 125 : index
    %29 = vector.load %arg6[%c0_22, %c125] : memref<4x600xf32, #tpu.memory_space<vmem>>, vector<4x400xf32>
    %c5 = arith.constant 5 : index
    %c0_23 = arith.constant 0 : index
    %c0_24 = arith.constant 0 : index
    %30 = vector.load %arg3[%c5, %c0_23, %c0_24] : memref<9x8x4xf32, #tpu.memory_space<vmem>>, vector<1x8x4xf32>
    %31 = vector.shape_cast %30 : vector<1x8x4xf32> to vector<8x4xf32>
    %cst_25 = arith.constant dense<0.000000e+00> : vector<8x400xf32>
    %32 = tpu.matmul %31, %29, %cst_25 {dimension_numbers = #tpu.dot_dimension_numbers<[1], [0], [0], [1], [0, 0, 1, 1], [], []>} : vector<8x4xf32>, vector<4x400xf32>, vector<8x400xf32> -> vector<8x400xf32>
    %33 = arith.addf %28, %32 : vector<8x400xf32>
    %c0_26 = arith.constant 0 : index
    %c150 = arith.constant 150 : index
    %34 = vector.load %arg6[%c0_26, %c150] : memref<4x600xf32, #tpu.memory_space<vmem>>, vector<4x400xf32>
    %c6 = arith.constant 6 : index
    %c0_27 = arith.constant 0 : index
    %c0_28 = arith.constant 0 : index
    %35 = vector.load %arg3[%c6, %c0_27, %c0_28] : memref<9x8x4xf32, #tpu.memory_space<vmem>>, vector<1x8x4xf32>
    %36 = vector.shape_cast %35 : vector<1x8x4xf32> to vector<8x4xf32>
    %cst_29 = arith.constant dense<0.000000e+00> : vector<8x400xf32>
    %37 = tpu.matmul %36, %34, %cst_29 {dimension_numbers = #tpu.dot_dimension_numbers<[1], [0], [0], [1], [0, 0, 1, 1], [], []>} : vector<8x4xf32>, vector<4x400xf32>, vector<8x400xf32> -> vector<8x400xf32>
    %38 = arith.addf %33, %37 : vector<8x400xf32>
    %c0_30 = arith.constant 0 : index
    %c175 = arith.constant 175 : index
    %39 = vector.load %arg6[%c0_30, %c175] : memref<4x600xf32, #tpu.memory_space<vmem>>, vector<4x400xf32>
    %c7 = arith.constant 7 : index
    %c0_31 = arith.constant 0 : index
    %c0_32 = arith.constant 0 : index
    %40 = vector.load %arg3[%c7, %c0_31, %c0_32] : memref<9x8x4xf32, #tpu.memory_space<vmem>>, vector<1x8x4xf32>
    %41 = vector.shape_cast %40 : vector<1x8x4xf32> to vector<8x4xf32>
    %cst_33 = arith.constant dense<0.000000e+00> : vector<8x400xf32>
    %42 = tpu.matmul %41, %39, %cst_33 {dimension_numbers = #tpu.dot_dimension_numbers<[1], [0], [0], [1], [0, 0, 1, 1], [], []>} : vector<8x4xf32>, vector<4x400xf32>, vector<8x400xf32> -> vector<8x400xf32>
    %43 = arith.addf %38, %42 : vector<8x400xf32>
    %c0_34 = arith.constant 0 : index
    %c200 = arith.constant 200 : index
    %44 = vector.load %arg6[%c0_34, %c200] : memref<4x600xf32, #tpu.memory_space<vmem>>, vector<4x400xf32>
    %c8 = arith.constant 8 : index
    %c0_35 = arith.constant 0 : index
    %c0_36 = arith.constant 0 : index
    %45 = vector.load %arg3[%c8, %c0_35, %c0_36] : memref<9x8x4xf32, #tpu.memory_space<vmem>>, vector<1x8x4xf32>
    %46 = vector.shape_cast %45 : vector<1x8x4xf32> to vector<8x4xf32>
    %cst_37 = arith.constant dense<0.000000e+00> : vector<8x400xf32>
    %47 = tpu.matmul %46, %44, %cst_37 {dimension_numbers = #tpu.dot_dimension_numbers<[1], [0], [0], [1], [0, 0, 1, 1], [], []>} : vector<8x4xf32>, vector<4x400xf32>, vector<8x400xf32> -> vector<8x400xf32>
    %48 = arith.addf %43, %47 : vector<8x400xf32>
    %c0_38 = arith.constant 0 : index
    %c0_39 = arith.constant 0 : index
    %49 = vector.load %arg4[%c0_38, %c0_39] : memref<8x1xf32, #tpu.memory_space<vmem>>, vector<8x1xf32>
    %50 = vector.broadcast %49 : vector<8x1xf32> to vector<8x400xf32>
    %51 = arith.addf %48, %50 : vector<8x400xf32>
    %c0_40 = arith.constant 0 : index
    %c0_41 = arith.constant 0 : index
    %c0_42 = arith.constant 0 : index
    %52 = vector.load %arg5[%c0_40, %c0_41, %c0_42] : memref<1x8x400xf32, #tpu.memory_space<vmem>>, vector<1x8x400xf32>
    %53 = vector.shape_cast %52 : vector<1x8x400xf32> to vector<8x400xf32>
    %54 = vector.shape_cast %51 : vector<8x400xf32> to vector<1x8x400xf32>
    tpu.vector_store %arg5[%c0_40, %c0_41, %c0_42], %54 {strides = array<i32>} : memref<1x8x400xf32, #tpu.memory_space<vmem>>, vector<1x8x400xf32>,
    return
  }
  func.func @transform_0(%arg0: i32, %arg1: i32) -> (i32, i32, i32) {
    %c0_i32 = arith.constant 0 : i32
    %c0_i32_0 = arith.constant 0 : i32
    %c0_i32_1 = arith.constant 0 : i32
    return %arg0, %c0_i32, %c0_i32_0 : i32, i32, i32
  }
  func.func @transform_1(%arg0: i32, %arg1: i32) -> (i32, i32, i32) {
    %c0_i32 = arith.constant 0 : i32
    %c0_i32_0 = arith.constant 0 : i32
    %c0_i32_1 = arith.constant 0 : i32
    return %c0_i32, %arg1, %c0_i32_0 : i32, i32, i32
  }
  func.func @transform_2(%arg0: i32, %arg1: i32) -> (i32, i32) {
    %c0_i32 = arith.constant 0 : i32
    %c0_i32_0 = arith.constant 0 : i32
    return %arg1, %c0_i32 : i32, i32
  }
  func.func @transform_3(%arg0: i32, %arg1: i32) -> (i32, i32, i32) {
    %c0_i32 = arith.constant 0 : i32
    %c0_i32_0 = arith.constant 0 : i32
    return %arg0, %arg1, %c0_i32 : i32, i32, i32
  }
}

</mosaic_0001>

<bundles_post_ra>
// kernel: tpu_custom_call.1
= control target key start
LH: loop header
LB: loop body
LE: loop exit
PB: predicated region body
PF: predicated region fallthrough
CT: control target
= control target key end

     0   :  { %8 = vsyncpa [#allocation4], 0  ;;  %s2505_s0 = inlined_call_operand.vmem [shape: f32[2,4,400], index: 0, kind: input, shape index: {}]   ;;  %s2506_s1 = inlined_call_operand.vmem [shape: f32[9,8,4], index: 1, kind: input, shape index: {}]   ;;  %s2507_s2 = inlined_call_operand.vmem [shape: f32[8,1], index: 2, kind: input, shape index: {}]   ;;  %s2508_s3 = inlined_call_operand.hbm [shape: f32[2,8,400], index: 3, kind: output, shape index: {}]  }
   0x1   :  { %10 = vsyncpa [#allocation4 + $0x1], 0  ;;  %s2251_s12 = smov 0   ;;  %s2253_s13 = smov 0  }
   0x2   :  { %s2255_s14 = smov 0   ;;  %s2257_s15 = smov 0  }
   0x3   :  { %s2259_s16 = smov 0   ;;  %s2261_s17 = smov 0  }
   0x4 LB: > { %s1956_s18 = sadd.s32 4294967295, %s2217_s17   ;;  %s1957_s19 = sadd.s32 4294967294, %s2217_s17   ;;  %s2217_s17 = sphi %s2261_s17, %s16_s17   ;;  %s2213_s16 = sphi %s2259_s16, %s2515_s16   ;;  %s2209_s15 = sphi %s2257_s15, %s2514_s15   ;;  %s2205_s14 = sphi %s2255_s14, %s2513_s14   ;;  %s2201_s13 = sphi %s2253_s13, %s2512_s13   ;;  %s2197_s12 = sphi %s2251_s12, %s2511_s12  }
   0x5   : > { %s28_s20 = sadd.s32 1, %s2213_s16  ;;  %s115_s21 = sadd.s32 1, %s2205_s14 }
   0x6   : > { %p30_p0 = scmp.ge.s32.totalorder %s28_s20, 2  ;;  %p125_p1 = scmp.ne.s32.totalorder %s2205_s14, %s2201_s13 }
   0x7   : > { %p126_p2 = scmp.eq.s32.totalorder %s1956_s18, 1  ;;  %p131_p3 = scmp.ne.s32.totalorder %s2201_s13, %s2197_s12 }
   0x8   : > { %s2517_s20 = smov (%p30_p0, %s28_s20), 0  ;;  %p132_p5 = scmp.eq.s32.totalorder %s1957_s19, 1 }
   0x9   : > { %p2291_p4 = por %p126_p2, %p125_p1  ;;  %s110_s23 = ssub.s32 %s2213_s16, %s2517_s20 }
   0xa   : > { %p1962_p6 = scmp.ge.s32.totalorder %s2217_s17, 1  ;;  %p113_p7 = scmp.eq.s32.totalorder %s110_s23, 0 }
   0xb   : > { %p2298_p8 = por %p132_p5, %p131_p3  ;;  %p172_p9 = scmp.lt.s32.totalorder %s2217_s17, 3 }
   0xc   : > { %s2304_s25 = scalar_select %p113_p7, %s2205_s14, %s115_s21  }
   0xd   : > { %p173_p10 = pnand %p1962_p6, %p172_p9 }
   0xe   : > { %p204_p11 = scmp.lt.s32.totalorder (!%p173_p10), %s2209_s15, 1  ;;  %vm221_vm0 = vcmask (!%p173_p10), 814080   ;;  %v2219_v0 = vmov (!%p173_p10), 0.0   ;;  %vm223_vm1 = vcmask (!%p173_p10), 1044384   ;;  %vm224_vm2 = vcmask (!%p173_p10), 719876   ;;  %s2220_s4 = smov (!%p173_p10), 100  }
   0xf   : > { %176 = sbr.rel (%p173_p10) target bundleno = 576 (0x240), region = 32  ;;  %222 = vst.msk [vmem:[#allocation2] sm:$0xf] (!%p173_p10), %vm221_vm0, %v2219_v0  ;;  %349 = vmatprep.mubr.f32.mxu0 (!%p173_p10), %v2219_v0  ;;  %420 = vmatprep.mubr.f32.mxu1 (!%p173_p10), %v2219_v0  ;;  %vm225_vm3 = vmor (!%p173_p10), %vm224_vm2, %vm223_vm1  ;;  %vm244_vm4 = vcmask (!%p173_p10), 1044256   ;;  %vm245_vm5 = vcmask (!%p173_p10), 1047556   ;;  %vm237_vm6 = vcmask (!%p173_p10), 818176  }
  0x10   : > { %226 = vst.msk [vmem:[#allocation2 + $0xc] sm:$0xff] (!%p173_p10), %vm225_vm3, %v2219_v0  ;;  %vm246_vm7 = vmor (!%p173_p10), %vm245_vm5, %vm244_vm4  ;;  %vm239_vm8 = vcmask (!%p173_p10), 1043456   ;;  %vm248_vm9 = vcmask (!%p173_p10), 949252   ;;  %s2221_s5 = smov (!%p173_p10), 103   ;;  %s2222_s6 = smov (!%p173_p10), 78   ;;  %v2229_v19 = vmov (!%p173_p10), 0  }
  0x11   : > { %vm249_vm10 = vmor (!%p173_p10), %vm248_vm9, %vm239_vm8  ;;  %s2223_s7 = smov (!%p173_p10), 53   ;;  %s2224_s8 = smov (!%p173_p10), 28   ;;  %2133 = vset.pattern.permute.xlu1 (!%p173_p10), %v2229_v19  ;;  %2134 = vset.pattern.permute.xlu0 (!%p173_p10), %v2229_v19  ;;  %v1824_v20 = vld [vmem:[%s2507_s2] sm:$0xff] (!%p173_p10)  ;;  %vm268_vm11 = vcmask (!%p173_p10), 842752   ;;  %v1966_v28 = vld [vmem:[%s2506_s1 + $0x8] sm:$0xff] (!%p173_p10)  ;;  %vm272_vm12 = vcmask (!%p173_p10), 31744  }
  0x12   : > { %s2225_s9 = smov (!%p173_p10), 3   ;;  %s2226_s10 = smov (!%p173_p10), 106   ;;  %vm596_vm13 = vcmask (!%p173_p10), 637952   ;;  %v253_v35 = vld [vmem:[%s2506_s1] sm:$0xff] (!%p173_p10)  ;;  %vm773_vm14 = vcmask (!%p173_p10), 433152   ;;  %v1979_v43 = vld [vmem:[%s2506_s1 + $0x10] sm:$0xff] (!%p173_p10) }
  0x13   : > { %s2227_s11 = smov (!%p173_p10), 81   ;;  %s2228_s18 = smov (!%p173_p10), 56   ;;  %vm950_vm15 = vcmask (!%p173_p10), 228352   ;;  %v1986_v51 = vld [vmem:[%s2506_s1 + $0x18] sm:$0xff] (!%p173_p10)  ;;  %vm1131_vm0 = vcmask (!%p173_p10), 23552   ;;  %v1993_v59 = vld [vmem:[%s2506_s1 + $0x20] sm:$0xff] (!%p173_p10) }
  0x14   : > { %vm1309_vm1 = vcmask (!%p173_p10), 867328   ;;  %vm1486_vm2 = vcmask (!%p173_p10), 662528   ;;  %vm1663_vm3 = vcmask (!%p173_p10), 457728   ;;  %s2034_s28 = sshll.u32 (!%p173_p10), %s2209_s15, 9  ;;  %vm1837_vm4 = vcmask (!%p173_p10), 130048  }
  0x16   : > { %s205_s26 = scalar_select %p204_p11, %s2209_s15, 1 }
  0x17   : > { %v1113_v16 = vld [vmem:[#allocation2 + $0x10] sm:$0xf] }
  0x18   : > { %s2033_s27 = sshll.u32 %s205_s26, 4  ;;  %s201_s26 = sand.u32 1, %s2201_s13  }
  0x19   : > { %s208_s30 = scalar_lea.vmem %s2505_s0, %s2033_s27  ;;  %s1963_s27 = sshll.u32 %s201_s26, 5 }
  0x1a   : > { %v227_v1 = vld [vmem:[%s208_s30] sm:$0xff]  ;;  %v228_v2 = vld [vmem:[%s208_s30 + $0x8] sm:$0xff]  ;;  %s203_s29 = scalar_lea.vmem [#allocation3], %s1963_s27  ;;  %s1840_s15 = scalar_lea.sflag [#allocation4], %s201_s26 }
  0x1b   : > { %231 = vrot.lane.b32.xlu0 %v227_v1, %s2220_s4  ;;  %s1856_s30 = sshll.u32 %s203_s29, 4  ;;  %s2460_s30 = int_to_ptr.vmem [resolvable:$true] %s1856_s30 }
  0x1f   : > { %233 = vrot.lane.b32.xlu0 %v228_v2, %s2220_s4 }
  0x8d   : > { %v232_v3 = vpop.permute.xlu0 %231 }
  0x8e   : > { %v235_v4 = vrot.slane %v232_v3, 4 }
  0x90   : > { %v238_v5 = vsel %vm237_vm6, %v235_v4, %v232_v3 }
  0x91   : > { %247 = vst.msk [vmem:[#allocation2] sm:$0xff] %vm246_vm7, %v238_v5  ;;  %v234_v6 = vpop.permute.xlu0 %233  ;;  %v2000_v5 = vld [vmem:[%s2506_s1 + $0x28] sm:$0xff] }
  0x92   : > { %v236_v7 = vrot.slane %v234_v6, 4 }
  0x94   : > { %v240_v8 = vsel %vm239_vm8, %v235_v4, %v236_v7 }
  0x95   : > { %v241_v9 = vsel %vm237_vm6, %v240_v8, %v234_v6 }
  0x96   : > { %250 = vst.msk [vmem:[#allocation2 + $0x8] sm:$0xff] %vm249_vm10, %v241_v9 }
  0x98   : > { %v2317_v10 = vld [vmem:[#allocation2] sm:$0xff] }
  0x99   : > { %260 = vrot.lane.b32.xlu0 %v2317_v10, %s2221_s5  ;;  %v2322_v11 = vcombine.high %v2317_v10, %v2317_v10 }
  0x9d   : > { %590 = vrot.lane.b32.xlu0 %v2322_v11, %s2222_s6  ;;  %v2325_v12 = vld [vmem:[#allocation2 + $0x8] sm:$0xff] }
  0x9e   : > { %264 = vrot.lane.b32.xlu1 %v2325_v12, %s2221_s5  ;;  %v2332_v13 = vcombine.high %v2325_v12, %v2325_v12  ;;  %v1294_v14 = vld [vmem:[#allocation2 + $0xc] sm:$0xff]  ;;  %v1293_v17 = vld [vmem:[#allocation2 + $0x4] sm:$0xff] }
  0x9f   : > { %v1300_v15 = vcombine.high %v1294_v14, %v1294_v14  ;;  %v1299_v18 = vcombine.high %v1293_v17, %v1293_v17 }
  0xa1   : > { %588 = vrot.lane.b32.xlu0 %v2317_v10, %s2222_s6 }
  0xa2   : > { %262 = vrot.lane.b32.xlu1 %v2322_v11, %s2221_s5 }
  0xa5   : > { %767 = vrot.lane.b32.xlu0 %v2322_v11, %s2223_s7 }
  0xa6   : > { %266 = vrot.lane.b32.xlu1 %v2332_v13, %s2221_s5 }
  0xa9   : > { %765 = vrot.lane.b32.xlu0 %v2317_v10, %s2223_s7 }
  0xaa   : > { %592 = vrot.lane.b32.xlu1 %v2325_v12, %s2222_s6 }
  0xad   : > { %944 = vrot.lane.b32.xlu0 %v2322_v11, %s2224_s8 }
  0xae   : > { %594 = vrot.lane.b32.xlu1 %v2332_v13, %s2222_s6  ;;  %s2458_s6 = scalar_lea.hbm %s2508_s3, %s2034_s28 }
  0xb1   : > { %942 = vrot.lane.b32.xlu0 %v2317_v10, %s2224_s8 }
  0xb2   : > { %769 = vrot.lane.b32.xlu1 %v2325_v12, %s2223_s7 }
  0xb5   : > { %1123 = vrot.lane.b32.xlu0 %v2322_v11, %s2225_s9 }
  0xb6   : > { %771 = vrot.lane.b32.xlu1 %v2332_v13, %s2223_s7  ;;  %s2139_s7 = scalar_lea.vmem %s2460_s30, 512 }
  0xb7   : > { %p2140_p12 = scmp.ne.s32.totalorder %s2460_s30, %s2139_s7 }
  0xb9   : > { %1127 = vrot.lane.b32.xlu0 %v2332_v13, %s2225_s9  ;;  %p2141_p13 = pnand %p2140_p12, %p2291_p4 }
  0xba   : > { %946 = vrot.lane.b32.xlu1 %v2325_v12, %s2224_s8 }
  0xbb   : > { %p2142_p0 = pneg %p2141_p13 }
  0xbd   : > { %1121 = vrot.lane.b32.xlu0 %v2317_v10, %s2225_s9 }
  0xbe   : > { %948 = vrot.lane.b32.xlu1 %v2332_v13, %s2224_s8  ;;  %s2230_s8 = smov [#allocation3]  }
  0xc1   : > { %1305 = vrot.lane.b32.xlu0 %v1294_v14, %s2226_s10 }
  0xc2   : > { %1125 = vrot.lane.b32.xlu1 %v2325_v12, %s2225_s9 }
  0xc5   : > { %1307 = vrot.lane.b32.xlu0 %v1300_v15, %s2226_s10 }
  0xc6   : > { %1129 = vrot.lane.b32.xlu1 %v1113_v16, %s2225_s9  ;;  %s2143_s9 = sshll.u32 %s2230_s8, 4  ;;  %s2144_s9 = int_to_ptr.vmem [resolvable:$false] %s2143_s9 }
  0xc7   : > { %p2146_p1 = scmp.lt.s32.totalorder %s2460_s30, %s2144_s9 }
  0xc9   : > { %1482 = vrot.lane.b32.xlu0 %v1294_v14, %s2227_s11 }
  0xca   : > { %1303 = vrot.lane.b32.xlu1 %v1299_v18, %s2226_s10 }
  0xcd   : > { %1484 = vrot.lane.b32.xlu0 %v1300_v15, %s2227_s11 }
  0xce   : > { %1301 = vrot.lane.b32.xlu1 %v1293_v17, %s2226_s10  ;;  %s2145_s10 = scalar_lea.vmem %s2144_s9, 1024 }
  0xcf   : > { %p2147_p2 = scmp.lt.s32.totalorder %s2145_s10, %s2139_s7 }
  0xd1   : > { %1659 = vrot.lane.b32.xlu0 %v1294_v14, %s2228_s18  ;;  %p2148_p3 = por %p2147_p2, %p2146_p1 }
  0xd2   : > { %1480 = vrot.lane.b32.xlu1 %v1299_v18, %s2227_s11 }
  0xd3   : > { %p2149_p5 = pnand %p2148_p3, %p2142_p0 }
  0xd5   : > { %1661 = vrot.lane.b32.xlu0 %v1300_v15, %s2228_s18 }
  0xd6   : > { %1478 = vrot.lane.b32.xlu1 %v1293_v17, %s2227_s11 }
  0xda   : > { %1657 = vrot.lane.b32.xlu1 %v1299_v18, %s2228_s18 }
  0xde   : > { %1655 = vrot.lane.b32.xlu1 %v1293_v17, %s2228_s18 }
  0xe2   : > { %1827 = vperm.xlu1 %2133, %v1824_v20   ;;  %v2014_v20 = vld [vmem:[%s2506_s1 + $0x38] sm:$0xff] }
 0x10b   : > { %v261_v21 = vpop.permute.xlu0 %260 }
 0x10f   : > { %v591_v22 = vpop.permute.xlu0 %590 }
 0x110   : > { %v265_v23 = vpop.permute.xlu1 %264 }
 0x113   : > { %v589_v24 = vpop.permute.xlu0 %588 }
 0x114   : > { %v263_v25 = vpop.permute.xlu1 %262  ;;  %v597_v37 = vsel %vm596_vm13, %v589_v24, %v591_v22  ;;  %v2021_v24 = vld [vmem:[%s2506_s1 + $0x40] sm:$0xff] }
 0x115   : > { %v270_v26 = vsel %vm268_vm11, %v263_v25, %v265_v23  ;;  %v269_v27 = vsel %vm268_vm11, %v261_v21, %v263_v25 }
 0x116   : > { %1967 = vmatprep.subr.msk.mxu0 %vm239_vm8, %v270_v26 }
 0x117   : > { %1968 = vmatpush1.msk.msra.mxu0 %vm239_vm8, %v269_v27  ;;  %v768_v29 = vpop.permute.xlu0 %767 }
 0x118   : > { %v267_v30 = vpop.permute.xlu1 %266  ;;  %1969 = vmatmul.mubr.msk.f32.vlgmr.msra.gmra.mrb[0].mxu0 %vm272_vm12, %v1966_v28  ;;  %1973 = vmatprep.subr.msk.mxu0 %vm239_vm8, %v2322_v11 }
 0x119   : > { %1970 = vmatprep.subr.msk.mxu1 %vm239_vm8, %v267_v30  ;;  %1974 = vmatpush1.msk.msra.mxu0 %vm239_vm8, %v2317_v10  ;;  %v271_v31 = vsel %vm268_vm11, %v265_v23, %v267_v30 }
 0x11a   : > { %1971 = vmatpush1.msk.msra.mxu1 %vm239_vm8, %v271_v31  ;;  %502 = vmatprep.mubr.f32.mxu0 %v2219_v0 }
 0x11b   : > { %1972 = vmatmul.mubr.msk.f32.vlgmr.msra.gmra.mrb[0].mxu1 %vm272_vm12, %v1966_v28  ;;  %1976 = vmatprep.subr.msk.mxu1 %vm239_vm8, %v2332_v13  ;;  %v766_v32 = vpop.permute.xlu0 %765 }
 0x11c   : > { %1977 = vmatpush1.msk.msra.mxu1 %vm239_vm8, %v2325_v12  ;;  %v593_v33 = vpop.permute.xlu1 %592  ;;  %573 = vmatprep.mubr.f32.mxu1 %v2219_v0  ;;  %v774_v45 = vsel %vm773_vm14, %v766_v32, %v768_v29  ;;  %v2007_v12 = vld [vmem:[%s2506_s1 + $0x30] sm:$0xff] }
 0x11d   : > { %v598_v34 = vsel %vm596_vm13, %v591_v22, %v593_v33 }
 0x11e   : > { %1980 = vmatprep.subr.msk.mxu0 %vm239_vm8, %v598_v34 }
 0x11f   : > { %v945_v36 = vpop.permute.xlu0 %944 }
 0x120   : > { %v595_v38 = vpop.permute.xlu1 %594  ;;  %1975 = vmatmul.mubr.msk.f32.vlgmr.msra.gmra.mrb[0].mxu0 %vm272_vm12, %v253_v35 }
 0x121   : > { %v599_v39 = vsel %vm596_vm13, %v593_v33, %v595_v38  ;;  %1981 = vmatpush1.msk.msra.mxu0 %vm239_vm8, %v597_v37  ;;  %1983 = vmatprep.subr.msk.mxu1 %vm239_vm8, %v595_v38 }
 0x122   : > { %675 = vmatprep.mubr.f32.mxu0 %v2219_v0 }
 0x123   : > { %1978 = vmatmul.mubr.msk.f32.vlgmr.msra.gmra.mrb[0].mxu1 %vm272_vm12, %v253_v35  ;;  %v943_v40 = vpop.permute.xlu0 %942 }
 0x124   : > { %1984 = vmatpush1.msk.msra.mxu1 %vm239_vm8, %v599_v39  ;;  %v770_v41 = vpop.permute.xlu1 %769  ;;  %746 = vmatprep.mubr.f32.mxu1 %v2219_v0  ;;  %v951_v53 = vsel %vm950_vm15, %v943_v40, %v945_v36 }
 0x125   : > { %v775_v42 = vsel %vm773_vm14, %v768_v29, %v770_v41 }
 0x126   : > { %1987 = vmatprep.subr.msk.mxu0 %vm239_vm8, %v775_v42 }
 0x127   : > { %v1124_v44 = vpop.permute.xlu0 %1123 }
 0x128   : > { %v772_v46 = vpop.permute.xlu1 %771  ;;  %1982 = vmatmul.mubr.msk.f32.vlgmr.msra.gmra.mrb[0].mxu0 %vm272_vm12, %v1979_v43 }
 0x129   : > { %v776_v47 = vsel %vm773_vm14, %v770_v41, %v772_v46  ;;  %1988 = vmatpush1.msk.msra.mxu0 %vm239_vm8, %v774_v45  ;;  %1990 = vmatprep.subr.msk.mxu1 %vm239_vm8, %v772_v46 }
 0x12a   : > { %852 = vmatprep.mubr.f32.mxu0 %v2219_v0 }
 0x12b   : > { %1985 = vmatmul.mubr.msk.f32.vlgmr.msra.gmra.mrb[0].mxu1 %vm272_vm12, %v1979_v43  ;;  %v1128_v48 = vpop.permute.xlu0 %1127 }
 0x12c   : > { %1991 = vmatpush1.msk.msra.mxu1 %vm239_vm8, %v776_v47  ;;  %v947_v49 = vpop.permute.xlu1 %946  ;;  %923 = vmatprep.mubr.f32.mxu1 %v2219_v0 }
 0x12d   : > { %v952_v50 = vsel %vm950_vm15, %v945_v36, %v947_v49 }
 0x12e   : > { %1994 = vmatprep.subr.msk.mxu0 %vm239_vm8, %v952_v50 }
 0x12f   : > { %v1122_v52 = vpop.permute.xlu0 %1121 }
 0x130   : > { %v949_v54 = vpop.permute.xlu1 %948  ;;  %1989 = vmatmul.mubr.msk.f32.vlgmr.msra.gmra.mrb[0].mxu0 %vm272_vm12, %v1986_v51  ;;  %v1132_v61 = vsel %vm1131_vm0, %v1122_v52, %v1124_v44 }
 0x131   : > { %v953_v55 = vsel %vm950_vm15, %v947_v49, %v949_v54  ;;  %1995 = vmatpush1.msk.msra.mxu0 %vm239_vm8, %v951_v53  ;;  %1997 = vmatprep.subr.msk.mxu1 %vm239_vm8, %v949_v54 }
 0x132   : > { %1029 = vmatprep.mubr.f32.mxu0 %v2219_v0 }
 0x133   : > { %1992 = vmatmul.mubr.msk.f32.vlgmr.msra.gmra.mrb[0].mxu1 %vm272_vm12, %v1986_v51  ;;  %v1306_v56 = vpop.permute.xlu0 %1305 }
 0x134   : > { %1998 = vmatpush1.msk.msra.mxu1 %vm239_vm8, %v953_v55  ;;  %v1126_v57 = vpop.permute.xlu1 %1125  ;;  %1100 = vmatprep.mubr.f32.mxu1 %v2219_v0 }
 0x135   : > { %v1133_v58 = vsel %vm1131_vm0, %v1124_v44, %v1126_v57  ;;  %v1134_v1 = vsel %vm1131_vm0, %v1126_v57, %v1128_v48 }
 0x136   : > { %2001 = vmatprep.subr.msk.mxu0 %vm239_vm8, %v1133_v58 }
 0x137   : > { %v1308_v60 = vpop.permute.xlu0 %1307 }
 0x138   : > { %v1130_v62 = vpop.permute.xlu1 %1129  ;;  %1996 = vmatmul.mubr.msk.f32.vlgmr.msra.gmra.mrb[0].mxu0 %vm272_vm12, %v1993_v59  ;;  %v1312_v9 = vsel %vm1309_vm1, %v1306_v56, %v1308_v60 }
 0x139   : > { %v1135_v63 = vsel %vm1131_vm0, %v1128_v48, %v1130_v62  ;;  %2002 = vmatpush1.msk.msra.mxu0 %vm239_vm8, %v1132_v61  ;;  %1211 = vmatprep.mubr.f32.mxu0 %v2219_v0 }
 0x13a   : > { %2004 = vmatprep.subr.msk.mxu1 %vm239_vm8, %v1135_v63 }
 0x13b   : > { %1999 = vmatmul.mubr.msk.f32.vlgmr.msra.gmra.mrb[0].mxu1 %vm272_vm12, %v1993_v59  ;;  %v1483_v2 = vpop.permute.xlu0 %1482 }
 0x13c   : > { %2005 = vmatpush1.msk.msra.mxu1 %vm239_vm8, %v1134_v1  ;;  %v1304_v3 = vpop.permute.xlu1 %1303  ;;  %1282 = vmatprep.mubr.f32.mxu1 %v2219_v0 }
 0x13d   : > { %v1311_v4 = vsel %vm1309_vm1, %v1304_v3, %v1306_v56  ;;  %2011 = vmatprep.subr.msk.mxu1 %vm239_vm8, %v1308_v60 }
 0x13e   : > { %2008 = vmatprep.subr.msk.mxu0 %vm239_vm8, %v1311_v4 }
 0x13f   : > { %v1485_v6 = vpop.permute.xlu0 %1484 }
 0x140   : > { %v1302_v7 = vpop.permute.xlu1 %1301  ;;  %2003 = vmatmul.mubr.msk.f32.vlgmr.msra.gmra.mrb[0].mxu0 %vm272_vm12, %v2000_v5  ;;  %v1489_v16 = vsel %vm1486_vm2, %v1483_v2, %v1485_v6 }
 0x141   : > { %v1310_v8 = vsel %vm1309_vm1, %v1302_v7, %v1304_v3  ;;  %1388 = vmatprep.mubr.f32.mxu0 %v2219_v0 }
 0x142   : > { %2009 = vmatpush1.msk.msra.mxu0 %vm239_vm8, %v1310_v8 }
 0x143   : > { %2006 = vmatmul.mubr.msk.f32.vlgmr.msra.gmra.mrb[0].mxu1 %vm272_vm12, %v2000_v5  ;;  %v1660_v13 = vpop.permute.xlu0 %1659 }
 0x144   : > { %2012 = vmatpush1.msk.msra.mxu1 %vm239_vm8, %v1312_v9  ;;  %v1481_v10 = vpop.permute.xlu1 %1480  ;;  %1459 = vmatprep.mubr.f32.mxu1 %v2219_v0 }
 0x145   : > { %v1488_v11 = vsel %vm1486_vm2, %v1481_v10, %v1483_v2  ;;  %2018 = vmatprep.subr.msk.mxu1 %vm239_vm8, %v1485_v6 }
 0x146   : > { %2015 = vmatprep.subr.msk.mxu0 %vm239_vm8, %v1488_v11 }
 0x147   : > { %v1662_v17 = vpop.permute.xlu0 %1661 }
 0x148   : > { %v1479_v14 = vpop.permute.xlu1 %1478  ;;  %2010 = vmatmul.mubr.msk.f32.vlgmr.msra.gmra.mrb[0].mxu0 %vm272_vm12, %v2007_v12  ;;  %v1666_v23 = vsel %vm1663_vm3, %v1660_v13, %v1662_v17 }
 0x149   : > { %v1487_v15 = vsel %vm1486_vm2, %v1479_v14, %v1481_v10  ;;  %1565 = vmatprep.mubr.f32.mxu0 %v2219_v0 }
 0x14a   : > { %2016 = vmatpush1.msk.msra.mxu0 %vm239_vm8, %v1487_v15 }
 0x14b   : > { %2013 = vmatmul.mubr.msk.f32.vlgmr.msra.gmra.mrb[0].mxu1 %vm272_vm12, %v2007_v12 }
 0x14c   : > { %2019 = vmatpush1.msk.msra.mxu1 %vm239_vm8, %v1489_v16  ;;  %v1658_v18 = vpop.permute.xlu1 %1657  ;;  %1636 = vmatprep.mubr.f32.mxu1 %v2219_v0 }
 0x14d   : > { %v1665_v19 = vsel %vm1663_vm3, %v1658_v18, %v1660_v13  ;;  %2025 = vmatprep.subr.msk.mxu1 %vm239_vm8, %v1662_v17 }
 0x14e   : > { %2022 = vmatprep.subr.msk.mxu0 %vm239_vm8, %v1665_v19 }
 0x150   : > { %v1656_v21 = vpop.permute.xlu1 %1655  ;;  %2017 = vmatmul.mubr.msk.f32.vlgmr.msra.gmra.mrb[0].mxu0 %vm272_vm12, %v2014_v20 }
 0x151   : > { %v1664_v22 = vsel %vm1663_vm3, %v1656_v21, %v1658_v18  ;;  %1742 = vmatprep.mubr.f32.mxu0 %v2219_v0 }
 0x152   : > { %2023 = vmatpush1.msk.msra.mxu0 %vm239_vm8, %v1664_v22 }
 0x153   : > { %2020 = vmatmul.mubr.msk.f32.vlgmr.msra.gmra.mrb[0].mxu1 %vm272_vm12, %v2014_v20 }
 0x154   : > { %2026 = vmatpush1.msk.msra.mxu1 %vm239_vm8, %v1666_v23  ;;  %1813 = vmatprep.mubr.f32.mxu1 %v2219_v0 }
 0x158   : > { %2024 = vmatmul.mubr.msk.f32.vlgmr.msra.gmra.mrb[0].mxu0 %vm272_vm12, %v2021_v24 }
 0x15b   : > { %2027 = vmatmul.mubr.msk.f32.vlgmr.msra.gmra.mrb[0].mxu1 %vm272_vm12, %v2021_v24 }
 0x161   : > { %v1828_v25 = vpop.permute.xlu1 %1827 }
 0x22b   : > { %v1744_v26 = vpop.f32.mrb[0].mxu0 }
 0x22c   : > { %v1830_v27 = vadd.f32 %v1828_v25, %v1744_v26  ;;  %v1746_v28 = vpop.f32.mrb[1].mxu0 }
 0x22d   : > { %v1831_v29 = vadd.f32 %v1828_v25, %v1746_v28 }
 0x22e   : > { %1834 = vst [vmem:[%s203_s29] sm:$0xff] %v1830_v27  ;;  %v1815_v0 = vpop.f32.mrb[0].mxu1 }
 0x22f   : > { %1835 = vst [vmem:[%s203_s29 + $0x8] sm:$0xff] %v1831_v29  ;;  %v1832_v30 = vadd.f32 %v1828_v25, %v1815_v0  ;;  %v1817_v31 = vpop.f32.mrb[1].mxu1 }
 0x230   : > { %v1833_v32 = vadd.f32 %v1828_v25, %v1817_v31 }
 0x231   : > { %1836 = vst [vmem:[%s203_s29 + $0x10] sm:$0xff] %v1832_v30 }
 0x232   : > { %1838 = vst.msk [vmem:[%s203_s29 + $0x18] sm:$0xff] %vm1837_vm4, %v1833_v32 }
 0x233   : > { %2152 = shalt.err (!%p2149_p5)
}
 0x234   : > { %s2153_s11 = scalar_lea.hbm %s2458_s6, 512  ;;  %s2157_s21 = scalar_lea.hbm %s2508_s3, 1024 }
 0x235   : > { %p2154_p6 = scmp.ne.s32.totalorder %s2458_s6, %s2153_s11  ;;  %p2158_p10 = scmp.lt.u32.totalorder %s2458_s6, %s2508_s3 }
 0x236   : > { %p2159_p11 = scmp.lt.u32.totalorder %s2157_s21, %s2153_s11  ;;  %p2161_p13 = scmp.lt.u32.totalorder %s2153_s11, %s2458_s6 }
 0x237   : > { %p2155_p7 = pnand %p2154_p6, %p2291_p4 }
 0x238   : > { %p2160_p12 = por %p2159_p11, %p2158_p10 }
 0x239   : > { %p2156_p9 = pneg %p2155_p7 }
 0x23a   : > { %p2162_p0 = por %p2161_p13, %p2160_p12 }
 0x23c   : > { %p2163_p1 = pnand %p2162_p0, %p2156_p9 }
 0x23e   : > { %2166 = shalt.err (!%p2163_p1)
}
 0x23f   : > { %2067 = dma.vmem_to_hbm [thread:$0]  (%p2291_p4), %s2460_s30, 512, %s2458_s6, %s1840_s15  }
 0x240 PF: > { %p2073_p2 = scmp.ge.s32.totalorder %s2217_s17, 2  ;;  %s1868_s27 = sand.u32 1, %s2197_s12  }
 0x241   : > { %s1869_s28 = scalar_lea.sflag [#allocation4], %s1868_s27 }
 0x242   : > { %p2070_p3 = pnand %p2073_p2, %p2298_p8 }
 0x244   : > { %2192 = dma.done.wait (!%p2070_p3), %s1869_s28, 512  }
 0x245   : > { %2194 = vsyncadd (!%p2070_p3), %s1869_s28, 4294966784  ;;  %s16_s17 = sadd.s32 1, %s2217_s17   ;;  %s2511_s12 = smov %s2201_s13 }
 0x246   : > { %p13_p5 = scmp.ge.s32.totalorder %s16_s17, 4   ;;  %s2512_s13 = smov %s2205_s14 }
 0x247   : > { %s2513_s14 = smov %s2304_s25  ;;  %s2514_s15 = smov %s2213_s16 }
 0x248   : > { %s2515_s16 = smov %s2517_s20  ;;  %15 = sbr.rel (!%p13_p5) target bundleno = 4 (0x4), region = 85 }
 0x24f   :  { %1874 = vsyncpa [#allocation4], 1 }
 0x250   :  { %1876 = vsyncpa [#allocation4 + $0x1], 1 }

</bundles_post_ra>
